<compile_context>
chip_gen: v7x
topology: tpu7x:2x2x1
jax: 0.10.0
libtpu: 0.0.40
codegen_flags: <defaults>
</compile_context>

<pallas_src>
import functools

import jax
import jax.numpy as jnp
from jax.experimental import pallas as pl
from jax.experimental.pallas import tpu as pltpu

_LANE = 128


def _round_up(x, m):
    return (x + m - 1) // m * m


# --------------------------------- kernel ----------------------------------

def _conv_bn_relu_pool_kernel(ntaps, pool, x_ref, w_ref, shift_ref, o_ref,
                              acc_ref, *sx):
    """Fused 3x3 conv (pad=1, BN scale pre-folded into w) + shift + ReLU
    [+ 2x2 max-pool].

    ntaps == 9 path:
      x_ref:  (1, H, W, Cin)      bf16  UNPADDED activation (halo built here)
      w_ref:  (9, Cin, Coutp)     bf16  tap-major, BN-scale-folded weights
      sx[0]:  (3, H+2, W, Cin)    bf16  scratch: the 3 dx-shifted views
    ntaps == 1 path (layer-0 K-packing, host-side im2col):
      x_ref:  (1, H, W, 9*Cin)    bf16
      w_ref:  (9*Cin, Coutp)      bf16
    shift_ref: (1, Coutp)         f32   folded BN shift (incl. conv bias)
    o_ref:     (1, Ho, Wo, Coutp) bf16
    acc_ref:   (H*W, Coutp)       f32   accumulator scratch
    """
    H, W, cin = x_ref.shape[1], x_ref.shape[2], x_ref.shape[3]
    coutp = acc_ref.shape[1]

    if ntaps == 1:
        # Layer-0: one (H*W, 9*Cin) x (9*Cin, Coutp) matmul.
        acc_ref[...] = jnp.dot(x_ref[0, :, :, :].reshape(H * W, cin),
                               w_ref[...],
                               preferred_element_type=jnp.float32)
    else:
        sx_ref = sx[0]
        # Build the three dx-shifted, zero-bordered views once: 3 sublane
        # relayout copies instead of one per tap (9).
        zrow = jnp.zeros((W, cin), x_ref.dtype)
        zcol = jnp.zeros((H, 1, cin), x_ref.dtype)
        for dx in range(3):
            sx_ref[dx, 0, :, :] = zrow            # top halo row
            sx_ref[dx, H + 1, :, :] = zrow        # bottom halo row
        sx_ref[1, pl.ds(1, H), :, :] = x_ref[0, :, :, :]
        sx_ref[0, pl.ds(1, H), pl.ds(0, 1), :] = zcol
        sx_ref[0, pl.ds(1, H), pl.ds(1, W - 1), :] = x_ref[0, :, pl.ds(0, W - 1), :]
        sx_ref[2, pl.ds(1, H), pl.ds(W - 1, 1), :] = zcol
        sx_ref[2, pl.ds(1, H), pl.ds(0, W - 1), :] = x_ref[0, :, pl.ds(1, W - 1), :]

        # 9 taps: (H*W, Cin) x (Cin, Coutp) bf16 MXU matmuls, ref-level f32
        # accumulation (MRB in-place accumulate path on v7x). dy row-slices of
        # sx_ref are leading-dim slices -> no further relayout.
        for dy in range(3):
            for dx in range(3):
                lhs = sx_ref[dx, pl.ds(dy, H), :, :].reshape(H * W, cin)
                contrib = jnp.dot(lhs, w_ref[dy * 3 + dx, :, :],
                                  preferred_element_type=jnp.float32)
                if dy == 0 and dx == 0:
                    acc_ref[...] = contrib
                else:
                    acc_ref[...] += contrib

    shift = shift_ref[...]                                       # (1, Coutp)
    if pool:
        # 2x2 max-pool straight off the accumulator: even/odd flat indices are
        # horizontal neighbours (W is even), then a row-pair max.  +shift and
        # ReLU commute with max, so they run on the 4x smaller result.
        hw = H * W
        e = acc_ref[pl.ds(0, hw // 2, stride=2), :]
        o = acc_ref[pl.ds(1, hw // 2, stride=2), :]
        t = jnp.maximum(e, o).reshape(H // 2, 2, W // 2, coutp)
        y = jnp.max(t, axis=1)                                   # (H/2, W/2, C)
        y = jnp.maximum(y + shift.reshape(1, 1, coutp), 0.0)
        o_ref[0, :, :, :] = y.astype(o_ref.dtype)
    else:
        y = jnp.maximum(acc_ref[...] + shift, 0.0)
        o_ref[0, :, :, :] = y.reshape(H, W, coutp).astype(o_ref.dtype)


def _conv_layer(x, wmat, shift, ntaps, pool):
    """x: (B,H,W,Cx) bf16; wmat: (9,Cx,Coutp) or (K,Coutp) bf16 (scale folded);
    shift: (1,Coutp) f32  ->  (B,Ho,Wo,Coutp) bf16."""
    B, H, W, cx = x.shape
    coutp = wmat.shape[-1]
    Ho, Wo = (H // 2, W // 2) if pool else (H, W)

    if ntaps == 9:
        w_spec = pl.BlockSpec((9, cx, coutp), lambda b: (0, 0, 0))
        scratch = [pltpu.VMEM((H * W, coutp), jnp.float32),
                   pltpu.VMEM((3, H + 2, W, cx), x.dtype)]
    else:
        w_spec = pl.BlockSpec((cx, coutp), lambda b: (0, 0))
        scratch = [pltpu.VMEM((H * W, coutp), jnp.float32)]

    flops = 2 * B * H * W * ntaps * wmat.shape[-2] * coutp
    bytes_accessed = (x.size * x.dtype.itemsize
                      + wmat.size * wmat.dtype.itemsize
                      + shift.size * 4 + B * Ho * Wo * coutp * 2)

    # VMEM budget: 2x x-tile + 2x weights + 2x out (bf16) + acc (f32) + sx (bf16).
    est_vmem = (2 * H * W * cx * 2 + 2 * wmat.size * 2 + 2 * Ho * Wo * coutp * 2
                + H * W * coutp * 4
                + (3 * (H + 2) * W * cx * 2 if ntaps == 9 else 0) + (1 << 16))
    vmem_limit = int(min(max(2 * est_vmem, 32 * 1024 * 1024), 112 * 1024 * 1024))

    return pl.pallas_call(
        functools.partial(_conv_bn_relu_pool_kernel, ntaps, pool),
        out_shape=jax.ShapeDtypeStruct((B, Ho, Wo, coutp), jnp.bfloat16),
        grid=(B,),
        in_specs=[
            pl.BlockSpec((1, H, W, cx), lambda b: (b, 0, 0, 0)),
            w_spec,
            pl.BlockSpec((1, coutp), lambda b: (0, 0)),
        ],
        out_specs=pl.BlockSpec((1, Ho, Wo, coutp), lambda b: (b, 0, 0, 0)),
        scratch_shapes=scratch,
        compiler_params=pltpu.CompilerParams(
            dimension_semantics=("parallel",), vmem_limit_bytes=vmem_limit),
        cost_estimate=pl.CostEstimate(flops=flops, transcendentals=0,
                                      bytes_accessed=bytes_accessed),
    )(x, wmat, shift)


# ----------------------------- host-side glue ------------------------------

def init_conv_block_params(key, in_features, out_features, num_conv):
    feats = [in_features] + [out_features] * num_conv
    params = []
    for i in range(num_conv):
        key, k1, k2, k3, k4, k5 = jax.random.split(key, 6)
        cin, cout = feats[i], feats[i + 1]
        params.append(dict(
            w=0.1 * jax.random.normal(k1, (cout, cin, 3, 3), jnp.float32),  # OIHW
            b=0.1 * jax.random.normal(k2, (cout,), jnp.float32),
            gamma=1.0 + 0.1 * jax.random.normal(k3, (cout,), jnp.float32),
            beta=0.1 * jax.random.normal(k4, (cout,), jnp.float32),
            rm=0.1 * jax.random.normal(k5, (cout,), jnp.float32),
            rv=jnp.ones((cout,), jnp.float32),
        ))
    return params


def conv_block_forward(params, x_nchw, pool):
    eps = 1e-5
    x = jnp.transpose(x_nchw, (0, 2, 3, 1))                     # NCHW -> NHWC
    B, H, W, _ = x.shape

    cout = x.shape[-1]
    for li, lp in enumerate(params):
        cout, cin = lp["w"].shape[0], lp["w"].shape[1]
        coutp = _round_up(cout, _LANE)
        if pool:
            assert H % 2 == 0 and W % 2 == 0, "pooling path requires even H, W"

        scale = lp["gamma"] / jnp.sqrt(lp["rv"] + eps)
        shift = lp["beta"] + scale * (lp["b"] - lp["rm"])
        shift_p = jnp.pad(shift, (0, coutp - cout)).reshape(1, coutp)
        shift_p = shift_p.astype(jnp.float32)

        # (Cout,Cin,3,3) OIHW -> (3,3,Cin,Cout); fold BN scale into the weights.
        w = jnp.transpose(lp["w"], (2, 3, 1, 0)) * scale[None, None, None, :]

        if li == 0 and 9 * cin <= _LANE:
            # Layer-0 K-packing: host-side im2col to K = 9*Cin, one matmul.
            xp = jnp.pad(x, ((0, 0), (1, 1), (1, 1), (0, 0)))
            x_in = jnp.concatenate(
                [xp[:, dy:dy + H, dx:dx + W, :]
                 for dy in range(3) for dx in range(3)],
                axis=-1).astype(jnp.bfloat16)                   # (B,H,W,9*Cin)
            wmat = jnp.pad(w.reshape(9 * cin, cout),
                           ((0, 0), (0, coutp - cout))).astype(jnp.bfloat16)
            ntaps = 1
        else:
            cx = x.shape[-1]                 # lanes of the current activation
            x_in = x.astype(jnp.bfloat16)
            wmat = jnp.pad(w, ((0, 0), (0, 0), (0, cx - cin),
                               (0, coutp - cout)))
            wmat = wmat.reshape(9, cx, coutp).astype(jnp.bfloat16)
            ntaps = 9

        x = _conv_layer(x_in, wmat, shift_p, ntaps, pool)
        B, H, W, _ = x.shape

    x = x[..., :cout].astype(jnp.float32)                       # drop channel pad
    return jnp.transpose(x, (0, 3, 1, 2))                       # NHWC -> NCHW


def conv_block_reference(params, x_nchw, pool):
    """Pure-JAX reference of the same math (eval-mode BN) for verification."""
    eps = 1e-5
    x = x_nchw
    for lp in params:
        y = jax.lax.conv_general_dilated(
            x, lp["w"], window_strides=(1, 1), padding=((1, 1), (1, 1)),
            dimension_numbers=("NCHW", "OIHW", "NCHW"),
            precision=jax.lax.Precision.HIGHEST)
        y = y + lp["b"][None, :, None, None]
        scale = lp["gamma"] / jnp.sqrt(lp["rv"] + eps)
        y = (scale[None, :, None, None] * (y - lp["rm"][None, :, None, None])
             + lp["beta"][None, :, None, None])
        y = jnp.maximum(y, 0.0)
        if pool:
            y = jax.lax.reduce_window(y, -jnp.inf, jax.lax.max,
                                      (1, 1, 2, 2), (1, 1, 2, 2), "VALID")
        x = y
    return x


if __name__ == "__main__":
    key = jax.random.PRNGKey(0)
    key, pkey, xkey = jax.random.split(key, 3)

    in_features, out_features, num_conv, pool = 4, 8, 2, True
    params = init_conv_block_params(pkey, in_features, out_features, num_conv)
    x = jax.random.normal(xkey, (2, in_features, 16, 16), jnp.float32)

    out = jax.block_until_ready(conv_block_forward(params, x, pool))
    ref = conv_block_reference(params, x, pool)

    assert out.shape == ref.shape == (2, out_features, 4, 4), (out.shape, ref.shape)
    # bf16 MXU inputs -> relative + absolute tolerance.
    err_ok = jnp.all(jnp.abs(out - ref) <= 2e-2 + 2e-2 * jnp.abs(ref))
    assert bool(err_ok), float(jnp.max(jnp.abs(out - ref)))
    print("KERNEL_OK")
</pallas_src>

<mosaic_0001>
module attributes {stable_mosaic.version = 11 : i64} {
  func.func @_conv_bn_relu_pool_kernel(%arg0: i32, %arg1: memref<1x16x16x36xbf16, #tpu.memory_space<vmem>>, %arg2: memref<36x128xbf16, #tpu.memory_space<vmem>>, %arg3: memref<1x128xf32, #tpu.memory_space<vmem>>, %arg4: memref<1x8x8x128xbf16, #tpu.memory_space<vmem>>, %arg5: memref<256x128xf32, #tpu.memory_space<vmem>>) attributes {dimension_semantics = [#tpu.dimension_semantics<parallel>], iteration_bounds = array<i64: 2>, scalar_prefetch = 0 : i64, scratch_operands = 1 : i64, tpu.core_type = #tpu.core_type<tc>, window_params = [{transform_indices = @transform_0, window_bounds = array<i64: 1, 16, 16, 36>}, {pipeline_mode = #tpu.pipeline_mode<synchronous>, transform_indices = @transform_1, window_bounds = array<i64: 36, 128>}, {pipeline_mode = #tpu.pipeline_mode<synchronous>, transform_indices = @transform_2, window_bounds = array<i64: 1, 128>}, {transform_indices = @transform_3, window_bounds = array<i64: 1, 8, 8, 128>}]} {
    %c0 = arith.constant 0 : index
    %c0_0 = arith.constant 0 : index
    %c0_1 = arith.constant 0 : index
    %c0_2 = arith.constant 0 : index
    %0 = vector.load %arg1[%c0, %c0_0, %c0_1, %c0_2] : memref<1x16x16x36xbf16, #tpu.memory_space<vmem>>, vector<1x16x16x36xbf16>
    %1 = vector.shape_cast %0 : vector<1x16x16x36xbf16> to vector<16x16x36xbf16>
    %2 = vector.shape_cast %1 : vector<16x16x36xbf16> to vector<256x36xbf16>
    %c0_3 = arith.constant 0 : index
    %c0_4 = arith.constant 0 : index
    %3 = vector.load %arg2[%c0_3, %c0_4] : memref<36x128xbf16, #tpu.memory_space<vmem>>, vector<36x128xbf16>
    %cst = arith.constant dense<0.000000e+00> : vector<256x128xf32>
    %4 = tpu.matmul %2, %3, %cst {dimension_numbers = #tpu.dot_dimension_numbers<[1], [0], [0], [1], [0, 0, 1, 1], [], []>} : vector<256x36xbf16>, vector<36x128xbf16>, vector<256x128xf32> -> vector<256x128xf32>
    %c0_5 = arith.constant 0 : index
    %c0_6 = arith.constant 0 : index
    %5 = vector.load %arg5[%c0_5, %c0_6] : memref<256x128xf32, #tpu.memory_space<vmem>>, vector<256x128xf32>
    tpu.vector_store %arg5[%c0_5, %c0_6], %4 {strides = array<i32>} : memref<256x128xf32, #tpu.memory_space<vmem>>, vector<256x128xf32>,
    %c0_7 = arith.constant 0 : index
    %c0_8 = arith.constant 0 : index
    %6 = vector.load %arg3[%c0_7, %c0_8] : memref<1x128xf32, #tpu.memory_space<vmem>>, vector<1x128xf32>
    %c0_9 = arith.constant 0 : index
    %c0_10 = arith.constant 0 : index
    %7 = tpu.strided_load %arg5[%c0_9, %c0_10] {strides = array<i32: 2, 1>} : memref<256x128xf32, #tpu.memory_space<vmem>>, vector<128x128xf32>
    %c1 = arith.constant 1 : index
    %c0_11 = arith.constant 0 : index
    %8 = tpu.strided_load %arg5[%c1, %c0_11] {strides = array<i32: 2, 1>} : memref<256x128xf32, #tpu.memory_space<vmem>>, vector<128x128xf32>
    %9 = arith.maximumf %7, %8 : vector<128x128xf32>
    %10 = vector.shape_cast %9 : vector<128x128xf32> to vector<8x2x8x128xf32>
    %cst_12 = arith.constant dense<0xFF800000> : vector<8x8x128xf32>
    %11 = vector.multi_reduction <maximumf>, %10, %cst_12 [1] : vector<8x2x8x128xf32> to vector<8x8x128xf32>
    %12 = vector.shape_cast %6 : vector<1x128xf32> to vector<1x1x128xf32>
    %13 = vector.broadcast %12 : vector<1x1x128xf32> to vector<8x8x128xf32>
    %14 = arith.addf %11, %13 : vector<8x8x128xf32>
    %cst_13 = arith.constant 0.000000e+00 : f32
    %15 = vector.broadcast %cst_13 : f32 to vector<8x8x128xf32>
    %16 = arith.maximumf %14, %15 : vector<8x8x128xf32>
    %17 = arith.truncf %16 : vector<8x8x128xf32> to vector<8x8x128xbf16>
    %c0_14 = arith.constant 0 : index
    %c0_15 = arith.constant 0 : index
    %c0_16 = arith.constant 0 : index
    %c0_17 = arith.constant 0 : index
    %18 = vector.load %arg4[%c0_14, %c0_15, %c0_16, %c0_17] : memref<1x8x8x128xbf16, #tpu.memory_space<vmem>>, vector<1x8x8x128xbf16>
    %19 = vector.shape_cast %18 : vector<1x8x8x128xbf16> to vector<8x8x128xbf16>
    %20 = vector.shape_cast %17 : vector<8x8x128xbf16> to vector<1x8x8x128xbf16>
    tpu.vector_store %arg4[%c0_14, %c0_15, %c0_16, %c0_17], %20 {strides = array<i32>} : memref<1x8x8x128xbf16, #tpu.memory_space<vmem>>, vector<1x8x8x128xbf16>,
    return
  }
  func.func @transform_0(%arg0: i32) -> (i32, i32, i32, i32) {
    %c0_i32 = arith.constant 0 : i32
    %c0_i32_0 = arith.constant 0 : i32
    %c0_i32_1 = arith.constant 0 : i32
    %c0_i32_2 = arith.constant 0 : i32
    return %arg0, %c0_i32, %c0_i32_0, %c0_i32_1 : i32, i32, i32, i32
  }
  func.func @transform_1(%arg0: i32) -> (i32, i32) {
    %c0_i32 = arith.constant 0 : i32
    %c0_i32_0 = arith.constant 0 : i32
    %c0_i32_1 = arith.constant 0 : i32
    return %c0_i32, %c0_i32_0 : i32, i32
  }
  func.func @transform_2(%arg0: i32) -> (i32, i32) {
    %c0_i32 = arith.constant 0 : i32
    %c0_i32_0 = arith.constant 0 : i32
    %c0_i32_1 = arith.constant 0 : i32
    return %c0_i32, %c0_i32_0 : i32, i32
  }
  func.func @transform_3(%arg0: i32) -> (i32, i32, i32, i32) {
    %c0_i32 = arith.constant 0 : i32
    %c0_i32_0 = arith.constant 0 : i32
    %c0_i32_1 = arith.constant 0 : i32
    %c0_i32_2 = arith.constant 0 : i32
    return %arg0, %c0_i32, %c0_i32_0, %c0_i32_1 : i32, i32, i32, i32
  }
}

</mosaic_0001>

<bundles_post_ra>
// kernel: tpu_custom_call.1
= control target key start
LH: loop header
LB: loop body
LE: loop exit
PB: predicated region body
PF: predicated region fallthrough
CT: control target
= control target key end

     0   :  { %8 = vsyncpa [#allocation4], 0  ;;  %s1449_s0 = inlined_call_operand.hbm [shape: bf16[2,16,16,36], index: 0, kind: input, shape index: {}]   ;;  %s1450_s1 = inlined_call_operand.hbm [shape: bf16[36,128], index: 1, kind: input, shape index: {}]   ;;  %s1451_s2 = inlined_call_operand.vmem [shape: f32[1,128], index: 2, kind: input, shape index: {}]   ;;  %s1452_s3 = inlined_call_operand.hbm [shape: bf16[2,8,8,128], index: 3, kind: output, shape index: {}]  }
   0x1   :  { %10 = vsyncpa [#allocation4 + $0x1], 0 }
   0x2   :  { %11 = vsyncpa [#allocation7], 0 }
   0x3   :  { %12 = vsyncpa [#allocation5], 0 }
   0x4   :  { %14 = vsyncpa [#allocation5 + $0x1], 0  ;;  %s1185_s12 = smov 0   ;;  %s1187_s13 = smov 0  }
   0x5   :  { %s1189_s14 = smov 0   ;;  %s1191_s15 = smov 0  }
   0x6 LB: > { %s1206_s16 = sadd.s32 4294967295, %s1156_s15   ;;  %s806_s17 = sadd.s32 4294967294, %s1156_s15   ;;  %s1156_s15 = sphi %s1191_s15, %s1472_s15   ;;  %s1152_s14 = sphi %s1189_s14, %s1471_s14   ;;  %s1148_s13 = sphi %s1187_s13, %s1470_s13   ;;  %s1144_s12 = sphi %s1185_s12, %s1469_s12  }
   0x7   : > { %p40_p0 = scmp.ne.s32.totalorder %s1148_s13, %s1144_s12  ;;  %p1453_p1 = scmp.eq.s32.totalorder %s1206_s16, 0 }
   0x8   : > { %p112_p3 = scmp.eq.s32.totalorder %s806_s17, 1  ;;  %p807_p5 = scmp.ge.s32.totalorder %s1156_s15, 1 }
   0x9   : > { %p1215_p4 = por %p1453_p1, %p40_p0  ;;  %p119_p7 = scmp.lt.s32.totalorder %s1156_s15, 3 }
   0xa   : > { %p1220_p6 = por %p112_p3, %p40_p0  ;;  %s1158_s21 = smov [#allocation6]  }
   0xb   : > { %s1456_s18 = scalar_select %p1215_p4, 1, 0 }
   0xc   : > { %s1457_s19 = scalar_select %p1220_p6, 1, 0 }
   0xd   : > { %p1225_p8 = pnand %p807_p5, %p119_p7  ;;  %s131_s22 = sshll.u32 %s1158_s21, 4  ;;  %s1229_s22 = int_to_ptr.vmem [resolvable:$true] %s131_s22 }
   0xe   : > { %s1241_s24 = sadd.s32 1, %s1156_s15   ;;  %s27_s25 = sadd.s32 1, %s1152_s14 }
   0xf   : > { %s1458_s20 = scalar_select %p1225_p8, 1, 0 }
  0x10   : > { %p956_p9 = pneg %p1225_p8  ;;  %s24_s26 = ssub.s32 %s1156_s15, %s1241_s24 }
  0x11   : > { %s1028_s29 = scalar_lea.hbm %s1450_s1, 320 }
  0x12   : > { %p1236_p11 = pnand %p956_p9, %p1453_p1  ;;  %p1029_p12 = scmp.ne.s32.totalorder %s1450_s1, %s1028_s29 }
  0x13   : > { %p1035_p5 = scmp.lt.u32.totalorder %s1028_s29, %s1450_s1 }
  0x14   : > { %p1030_p13 = pneg %p1236_p11 }
  0x16   : > { %p1031_p0 = pnand %p1030_p13, %p1029_p12 }
  0x18   : > { %p1032_p3 = pneg %p1031_p0 }
  0x1a   : > { %p1037_p7 = pnand %p1035_p5, %p1032_p3 }
  0x1c   : > { %1040 = shalt.err (!%p1037_p7)
}
  0x1d   : > { %s1041_s7 = scalar_lea.vmem %s1229_s22, 320  ;;  %p1049_p2 = scmp.lt.s32.totalorder %s1229_s22, %s1229_s22 }
  0x1e   : > { %p1042_p9 = scmp.ne.s32.totalorder %s1229_s22, %s1041_s7  ;;  %p1050_p6 = scmp.lt.s32.totalorder %s1041_s7, %s1041_s7 }
  0x20   : > { %p1044_p10 = pnand %p1042_p9, %p1030_p13  ;;  %p1051_p4 = por %p1050_p6, %p1049_p2 }
  0x22   : > { %p1045_p1 = pneg %p1044_p10 }
  0x24   : > { %p1052_p8 = pnand %p1051_p4, %p1045_p1 }
  0x26   : > { %1055 = shalt.err (!%p1052_p8)
}
  0x27   : > { %s1159_s8 = smov 64   ;;  %s1160_s9 = smov 4  }
  0x28   : > { %959 = dma.hbm_to_vmem [thread:$0]  (!%p1236_p11), %s1450_s1, 320, %s1229_s22, [#allocation7], %s1159_s8, %s1159_s8, %s1160_s9  }
  0x29   : > { %p25_p1 = scmp.eq.s32.totalorder %s24_s26, 0  ;;  %p34_p2 = scmp.ne.s32.totalorder %s1152_s14, %s1148_s13 }
  0x2a   : > { %p35_p4 = scmp.eq.s32.totalorder %s1156_s15, 0  ;;  %p969_p6 = scmp.lt.s32.totalorder %s1156_s15, 2 }
  0x2b   : > { %s1275_s17 = scalar_select %p25_p1, %s1152_s14, %s27_s25  }
  0x2c   : > { %p36_p8 = por %p35_p4, %p34_p2  ;;  %p1460_p10 = scmp.eq.s32.totalorder %s1206_s16, 1 }
  0x2d   : > { %s148_s23 = sand.u32 1, %s1152_s14   ;;  %s858_s27 = sshll.u32 %s1156_s15, 11 }
  0x2e   : > { %p1279_p12 = por %p1460_p10, %p34_p2  ;;  %s810_s28 = sshll.u32 %s148_s23, 7 }
  0x2f   : > { %s1288_s4 = scalar_lea.hbm %s1449_s0, %s858_s27  ;;  %s152_s22 = scalar_lea.vmem [#allocation3], %s810_s28 }
  0x30   : > { %s159_s25 = sshll.u32 %s152_s22, 4  ;;  %p1290_p11 = pnand %p969_p6, %p36_p8  ;;  %s1294_s25 = int_to_ptr.vmem [resolvable:$true] %s159_s25 }
  0x31   : > { %s1296_s5 = scalar_lea.sflag [#allocation4], %s148_s23  ;;  %s1056_s6 = scalar_lea.hbm %s1288_s4, 2048 }
  0x32   : > { %p1057_p13 = scmp.ne.s32.totalorder %s1288_s4, %s1056_s6  ;;  %p1058_p0 = pneg %p1290_p11 }
  0x33   : > { %s1061_s11 = scalar_lea.hbm %s1449_s0, 4096  ;;  %p1062_p7 = scmp.lt.u32.totalorder %s1288_s4, %s1449_s0 }
  0x34   : > { %p1059_p3 = pnand %p1058_p0, %p1057_p13  ;;  %p1063_p9 = scmp.lt.u32.totalorder %s1061_s11, %s1056_s6 }
  0x35   : > { %p1065_p2 = scmp.lt.u32.totalorder %s1056_s6, %s1288_s4 }
  0x36   : > { %p1060_p5 = pneg %p1059_p3  ;;  %p1064_p1 = por %p1063_p9, %p1062_p7 }
  0x38   : > { %p1066_p4 = por %p1065_p2, %p1064_p1 }
  0x3a   : > { %p1067_p6 = pnand %p1066_p4, %p1060_p5 }
  0x3c   : > { %1070 = shalt.err (!%p1067_p6)
}
  0x3d   : > { %s1071_s23 = scalar_lea.vmem %s1294_s25, 2048  ;;  %s1161_s29 = smov [#allocation3]  }
  0x3e   : > { %p1072_p8 = scmp.ne.s32.totalorder %s1294_s25, %s1071_s23  ;;  %s1076_s30 = sshll.u32 %s1161_s29, 4  ;;  %s1077_s30 = int_to_ptr.vmem [resolvable:$false] %s1076_s30 }
  0x3f   : > { %s1078_s22 = scalar_lea.vmem %s1077_s30, 4096  ;;  %p1079_p3 = scmp.lt.s32.totalorder %s1294_s25, %s1077_s30 }
  0x40   : > { %p1074_p10 = pnand %p1072_p8, %p1058_p0  ;;  %p1080_p7 = scmp.lt.s32.totalorder %s1078_s22, %s1071_s23 }
  0x42   : > { %p1075_p13 = pneg %p1074_p10  ;;  %p1081_p9 = por %p1080_p7, %p1079_p3 }
  0x44   : > { %p1082_p1 = pnand %p1081_p9, %p1075_p13 }
  0x46   : > { %1085 = shalt.err (!%p1082_p1)
}
  0x47   : > { %963 = dma.hbm_to_vmem [thread:$0]  (!%p1290_p11), %s1288_s4, 2048, %s1294_s25, %s1296_s5, %s1159_s8, %s1159_s8, %s1160_s9  }
  0x48   : > { %p1463_p0 = scmp.ne.s32.totalorder %s1458_s20, 0 }
  0x49   : > { %s1330_s6 = sand.u32 (!%p1463_p0), 1, %s1148_s13   ;;  %p1464_p5 = scmp.ne.s32.totalorder (!%p1463_p0), %s1456_s18, 0 }
  0x4a   : > { %171 = sbr.rel (%p1463_p0) target bundleno = 373 (0x175), region = 32  ;;  %s814_s7 = sshll.u32 (!%p1463_p0), %s1330_s6, 7 }
  0x4b   : > { %s174_s10 = scalar_lea.sflag (!%p1463_p0), [#allocation4], %s1330_s6  ;;  %s1334_s11 = scalar_lea.vmem (!%p1463_p0), [#allocation3], %s814_s7 }
  0x51   : > { %1131 = dma.done.wait (%p1464_p5), %s174_s10, 2048  }
  0x52   : > { %1133 = vsyncadd (%p1464_p5), %s174_s10, 4294965248  ;;  %p1465_p11 = scmp.eq.s32.totalorder %s1206_s16, 0 }
  0x54   : > { %1135 = dma.done.wait (%p1465_p11), [#allocation7], 320   ;;  %p1466_p2 = pmov %p1465_p11 }
  0x55   : > { %v1009_v0 = vld [vmem:[#allocation6] sm:$0xff]   ;;  %v1010_v1 = vld [vmem:[#allocation6 + $0x8] sm:$0xff]   ;;  %vm337_vm0 = vcmask 293888   ;;  %v1011_v2 = vld [vmem:[#allocation6 + $0x10] ss:$0 sps:$4 sm:$0x33]  }
  0x56   : > { %1137 = vsyncadd (%p1466_p2), [#allocation7], 4294966976  ;;  %902 = vmatprep.subr.bf16.mxu0 %v1009_v0  ;;  %940 = vmatprep.subr.bf16.mxu1 %v1009_v0  ;;  %v1012_v3 = vld [vmem:[%s1334_s11] sm:$0xff]   ;;  %vm386_vm1 = vcmask 1041408   ;;  %v1014_v6 = vld [vmem:[%s1334_s11 + $0x8] sm:$0xff]   ;;  %s816_s8 = sshll.u32 %s1330_s6, 5 }
  0x57   : > { %903 = vmatpush3.bf16.msra.mxu0 %v1009_v0  ;;  %943 = vmatpush3.bf16.msra.mxu1 %v1009_v0  ;;  %v1013_v4 = vld [vmem:[%s1334_s11 + $0x40] sm:$0xff]   ;;  %v388_v5 = vsel %vm386_vm1, %v1011_v2, 0  ;;  %v1015_v7 = vld [vmem:[%s1334_s11 + $0x48] sm:$0xff]   ;;  %v1016_v8 = vld [vmem:[%s1334_s11 + $0x10] sm:$0xff]   ;;  %s1388_s9 = scalar_lea.vmem [#allocation8], %s816_s8  ;;  %s859_s4 = sshll.u32 %s1206_s16, 9 }
  0x58   : > { %904 = vmatprep.subr.bf16.mxu0 %v1010_v1  ;;  %941 = vmatprep.subr.bf16.mxu1 %v1010_v1  ;;  %v1017_v9 = vld [vmem:[%s1334_s11 + $0x50] sm:$0xff]   ;;  %v1018_v10 = vld [vmem:[%s1334_s11 + $0x18] sm:$0xff]   ;;  %v1020_v12 = vld [vmem:[%s1334_s11 + $0x20] sm:$0xff]   ;;  %s723_s25 = sshll.u32 %s1388_s9, 4  ;;  %s1401_s27 = scalar_lea.hbm %s1452_s3, %s859_s4  ;;  %s1403_s25 = int_to_ptr.vmem [resolvable:$true] %s723_s25 }
  0x59   : > { %908 = vmatprep.mubr.msk.bf16.mxu0 %vm337_vm0, %v1012_v3  ;;  %924 = vmatprep.mubr.msk.bf16.mxu1 %vm337_vm0, %v1013_v4  ;;  %v1019_v11 = vld [vmem:[%s1334_s11 + $0x58] sm:$0xff]   ;;  %v1021_v13 = vld [vmem:[%s1334_s11 + $0x60] sm:$0xff]   ;;  %v1022_v14 = vld [vmem:[%s1334_s11 + $0x28] sm:$0xff]   ;;  %s710_s16 = scalar_lea.sflag [#allocation5], %s1330_s6  ;;  %s1086_s28 = scalar_lea.vmem %s1403_s25, 512 }
  0x5a   : > { %v1023_v15 = vld [vmem:[%s1334_s11 + $0x68] sm:$0xff]   ;;  %v1024_v16 = vld [vmem:[%s1334_s11 + $0x30] sm:$0xff]   ;;  %v1026_v18 = vld [vmem:[%s1334_s11 + $0x38] sm:$0xff]   ;;  %p1087_p4 = scmp.ne.s32.totalorder %s1403_s25, %s1086_s28  ;;  %s1162_s23 = smov [#allocation8]  }
  0x5b   : > { %905 = vmatpush3.bf16.msra.mxu0 %v1010_v1  ;;  %944 = vmatpush3.bf16.msra.mxu1 %v1010_v1  ;;  %v1025_v17 = vld [vmem:[%s1334_s11 + $0x70] sm:$0xff]   ;;  %v1027_v19 = vld [vmem:[%s1334_s11 + $0x78] sm:$0xff]   ;;  %v1379_v56 = vld [vmem:[%s1451_s2] ss:$0 sm:$0xff]  ;;  %s1090_s29 = sshll.u32 %s1162_s23, 4  ;;  %s1091_s29 = int_to_ptr.vmem [resolvable:$false] %s1090_s29 }
  0x5c   : > { %946 = vmatprep.subr.msk.bf16.mxu0 %vm386_vm1, %v1011_v2  ;;  %947 = vmatprep.subr.msk.bf16.mxu1 %vm386_vm1, %v1011_v2  ;;  %p1088_p6 = pnand %p1087_p4, %p1279_p12  ;;  %s1092_s30 = scalar_lea.vmem %s1091_s29, 1024 }
  0x5d   : > { %p1093_p10 = scmp.lt.s32.totalorder %s1403_s25, %s1091_s29  ;;  %p1094_p13 = scmp.lt.s32.totalorder %s1092_s30, %s1086_s28 }
  0x5e   : > { %p1089_p8 = pneg %p1088_p6 }
  0x5f   : > { %907 = vmatpush3.bf16.msra.mxu0 %v388_v5  ;;  %945 = vmatpush3.bf16.msra.mxu1 %v388_v5  ;;  %p1095_p3 = por %p1094_p13, %p1093_p10 }
  0x61   : > { %p1096_p7 = pnand %p1095_p3, %p1089_p8 }
  0x62   : > { %909 = vmatmul.mubr.msk.bf16.vlgmr.msra.gmra.mrb[0].mxu0 %vm337_vm0, %v1014_v6  ;;  %925 = vmatmul.mubr.msk.bf16.vlgmr.msra.gmra.mrb[0].mxu1 %vm337_vm0, %v1015_v7 }
  0x63   : > { %912 = vmatprep.mubr.msk.bf16.mxu0 %vm337_vm0, %v1016_v8  ;;  %928 = vmatprep.mubr.msk.bf16.mxu1 %vm337_vm0, %v1017_v9 }
  0x6a   : > { %913 = vmatmul.mubr.msk.bf16.gmra.mrb[4].mxu0 %vm337_vm0, %v1018_v10  ;;  %929 = vmatmul.mubr.msk.bf16.gmra.mrb[4].mxu1 %vm337_vm0, %v1019_v11 }
  0x6b   : > { %916 = vmatprep.mubr.msk.bf16.mxu0 %vm337_vm0, %v1020_v12  ;;  %932 = vmatprep.mubr.msk.bf16.mxu1 %vm337_vm0, %v1021_v13 }
  0x72   : > { %917 = vmatmul.mubr.msk.bf16.gmra.mrb[8].mxu0 %vm337_vm0, %v1022_v14  ;;  %933 = vmatmul.mubr.msk.bf16.gmra.mrb[8].mxu1 %vm337_vm0, %v1023_v15 }
  0x73   : > { %920 = vmatprep.mubr.msk.bf16.mxu0 %vm337_vm0, %v1024_v16  ;;  %936 = vmatprep.mubr.msk.bf16.mxu1 %vm337_vm0, %v1025_v17 }
  0x7a   : > { %921 = vmatmul.mubr.msk.bf16.gmra.mrb[12].mxu0 %vm337_vm0, %v1026_v18  ;;  %937 = vmatmul.mubr.msk.bf16.gmra.mrb[12].mxu1 %vm337_vm0, %v1027_v19 }
 0x135   : > { %v910_v20 = vpop.f32.mrb[0].mxu0  ;;  %v926_v21 = vpop.f32.mrb[0].mxu1 }
 0x136   : > { %553 = vst [vmem:[#allocation2 + $0x10] sm:$0xff] %v910_v20  ;;  %569 = vst [vmem:[#allocation2 + $0x90] sm:$0xff] %v926_v21  ;;  %v424_v22 = vpop.f32.mrb[1].mxu0  ;;  %v488_v23 = vpop.f32.mrb[1].mxu1 }
 0x137   : > { %551 = vst [vmem:[#allocation2] sm:$0xff] %v424_v22  ;;  %567 = vst [vmem:[#allocation2 + $0x80] sm:$0xff] %v488_v23  ;;  %v911_v24 = vpop.f32.mrb[2].mxu0  ;;  %v927_v25 = vpop.f32.mrb[2].mxu1 }
 0x138   : > { %554 = vst [vmem:[#allocation2 + $0x18] sm:$0xff] %v911_v24  ;;  %570 = vst [vmem:[#allocation2 + $0x98] sm:$0xff] %v927_v25  ;;  %v427_v26 = vpop.f32.mrb[3].mxu0  ;;  %v491_v27 = vpop.f32.mrb[3].mxu1 }
 0x139   : > { %552 = vst [vmem:[#allocation2 + $0x8] sm:$0xff] %v427_v26  ;;  %568 = vst [vmem:[#allocation2 + $0x88] sm:$0xff] %v491_v27 }
 0x13d   : > { %v914_v28 = vpop.f32.mrb[4].mxu0  ;;  %v930_v29 = vpop.f32.mrb[4].mxu1 }
 0x13e   : > { %557 = vst [vmem:[#allocation2 + $0x30] sm:$0xff] %v914_v28  ;;  %573 = vst [vmem:[#allocation2 + $0xb0] sm:$0xff] %v930_v29  ;;  %v440_v30 = vpop.f32.mrb[5].mxu0  ;;  %v504_v31 = vpop.f32.mrb[5].mxu1 }
 0x13f   : > { %v586_v32 = vld [vmem:[#allocation2 + $0x10] ss:$2 sm:$0xff]  ;;  %v618_v33 = vld [vmem:[#allocation2 + $0x11] ss:$2 sm:$0xff]  ;;  %555 = vst [vmem:[#allocation2 + $0x20] sm:$0xff] %v440_v30  ;;  %571 = vst [vmem:[#allocation2 + $0xa0] sm:$0xff] %v504_v31 }
 0x140   : > { %v602_v34 = vld [vmem:[#allocation2 + $0x90] ss:$2 sm:$0xff]  ;;  %v634_v35 = vld [vmem:[#allocation2 + $0x91] ss:$2 sm:$0xff]  ;;  %v584_v36 = vld [vmem:[#allocation2] ss:$2 sm:$0xff]  ;;  %v648_v44 = vmax.f32 %v586_v32, %v618_v33 }
 0x141   : > { %v616_v37 = vld [vmem:[#allocation2 + $0x1] ss:$2 sm:$0xff]  ;;  %v600_v38 = vld [vmem:[#allocation2 + $0x80] ss:$2 sm:$0xff]  ;;  %v915_v40 = vpop.f32.mrb[6].mxu0  ;;  %v931_v41 = vpop.f32.mrb[6].mxu1  ;;  %v656_v45 = vmax.f32 %v602_v34, %v634_v35 }
 0x142   : > { %v632_v39 = vld [vmem:[#allocation2 + $0x81] ss:$2 sm:$0xff]  ;;  %558 = vst [vmem:[#allocation2 + $0x38] sm:$0xff] %v915_v40  ;;  %574 = vst [vmem:[#allocation2 + $0xb8] sm:$0xff] %v931_v41  ;;  %v443_v42 = vpop.f32.mrb[7].mxu0  ;;  %v507_v43 = vpop.f32.mrb[7].mxu1  ;;  %v647_v46 = vmax.f32 %v584_v36, %v616_v37 }
 0x143   : > { %556 = vst [vmem:[#allocation2 + $0x28] sm:$0xff] %v443_v42  ;;  %572 = vst [vmem:[#allocation2 + $0xa8] sm:$0xff] %v507_v43  ;;  %v655_v47 = vmax.f32 %v600_v38, %v632_v39 }
 0x144   : > { %v663_v57 = vmax.f32 %v647_v46, %v648_v44 }
 0x145   : > { %v918_v48 = vpop.f32.mrb[8].mxu0  ;;  %v934_v49 = vpop.f32.mrb[8].mxu1  ;;  %v667_v58 = vmax.f32 %v655_v47, %v656_v45 }
 0x146   : > { %561 = vst [vmem:[#allocation2 + $0x50] sm:$0xff] %v918_v48  ;;  %577 = vst [vmem:[#allocation2 + $0xd0] sm:$0xff] %v934_v49  ;;  %v456_v50 = vpop.f32.mrb[9].mxu0  ;;  %v520_v51 = vpop.f32.mrb[9].mxu1  ;;  %v677_v7 = vadd.f32 %v1379_v56, %v663_v57 }
 0x147   : > { %559 = vst [vmem:[#allocation2 + $0x40] sm:$0xff] %v456_v50  ;;  %575 = vst [vmem:[#allocation2 + $0xc0] sm:$0xff] %v520_v51  ;;  %v919_v52 = vpop.f32.mrb[10].mxu0  ;;  %v935_v53 = vpop.f32.mrb[10].mxu1  ;;  %v681_v8 = vadd.f32 %v1379_v56, %v667_v58 }
 0x148   : > { %562 = vst [vmem:[#allocation2 + $0x58] sm:$0xff] %v919_v52  ;;  %578 = vst [vmem:[#allocation2 + $0xd8] sm:$0xff] %v935_v53  ;;  %v459_v54 = vpop.f32.mrb[11].mxu0  ;;  %v523_v55 = vpop.f32.mrb[11].mxu1  ;;  %v685_v19 = vmax.f32 %v677_v7, 0.0 }
 0x149   : > { %v590_v59 = vld [vmem:[#allocation2 + $0x30] ss:$2 sm:$0xff]  ;;  %v622_v60 = vld [vmem:[#allocation2 + $0x31] ss:$2 sm:$0xff]  ;;  %560 = vst [vmem:[#allocation2 + $0x48] sm:$0xff] %v459_v54  ;;  %576 = vst [vmem:[#allocation2 + $0xc8] sm:$0xff] %v523_v55 }
 0x14a   : > { %v606_v61 = vld [vmem:[#allocation2 + $0xb0] ss:$2 sm:$0xff]  ;;  %v650_v62 = vmax.f32 %v590_v59, %v622_v60  ;;  %v638_v63 = vld [vmem:[#allocation2 + $0xb1] ss:$2 sm:$0xff]  ;;  %v588_v0 = vld [vmem:[#allocation2 + $0x20] ss:$2 sm:$0xff] }
 0x14b   : > { %v620_v1 = vld [vmem:[#allocation2 + $0x21] ss:$2 sm:$0xff]  ;;  %v658_v2 = vmax.f32 %v606_v61, %v638_v63  ;;  %v604_v4 = vld [vmem:[#allocation2 + $0xa0] ss:$2 sm:$0xff]  ;;  %v689_v20 = vmax.f32 %v681_v8, 0.0 }
 0x14c   : > { %v649_v3 = vmax.f32 %v588_v0, %v620_v1  ;;  %v636_v5 = vld [vmem:[#allocation2 + $0xa1] ss:$2 sm:$0xff] }
 0x14d   : > { %v657_v6 = vmax.f32 %v604_v4, %v636_v5  ;;  %v922_v9 = vpop.f32.mrb[12].mxu0  ;;  %v938_v10 = vpop.f32.mrb[12].mxu1 }
 0x14e   : > { %v664_v11 = vmax.f32 %v649_v3, %v650_v62  ;;  %565 = vst [vmem:[#allocation2 + $0x70] sm:$0xff] %v922_v9  ;;  %581 = vst [vmem:[#allocation2 + $0xf0] sm:$0xff] %v938_v10  ;;  %v472_v12 = vpop.f32.mrb[13].mxu0  ;;  %v536_v13 = vpop.f32.mrb[13].mxu1 }
 0x14f   : > { %v668_v14 = vmax.f32 %v657_v6, %v658_v2  ;;  %563 = vst [vmem:[#allocation2 + $0x60] sm:$0xff] %v472_v12  ;;  %579 = vst [vmem:[#allocation2 + $0xe0] sm:$0xff] %v536_v13  ;;  %v594_v16 = vld [vmem:[#allocation2 + $0x50] ss:$2 sm:$0xff]  ;;  %v626_v17 = vld [vmem:[#allocation2 + $0x51] ss:$2 sm:$0xff] }
 0x150   : > { %v678_v15 = vadd.f32 %v1379_v56, %v664_v11  ;;  %v610_v21 = vld [vmem:[#allocation2 + $0xd0] ss:$2 sm:$0xff]  ;;  %v592_v22 = vld [vmem:[#allocation2 + $0x40] ss:$2 sm:$0xff]  ;;  %v923_v23 = vpop.f32.mrb[14].mxu0  ;;  %v939_v24 = vpop.f32.mrb[14].mxu1  ;;  %v652_v35 = vmax.f32 %v594_v16, %v626_v17 }
 0x151   : > { %v682_v18 = vadd.f32 %v1379_v56, %v668_v14  ;;  %v624_v25 = vld [vmem:[#allocation2 + $0x41] ss:$2 sm:$0xff]  ;;  %566 = vst [vmem:[#allocation2 + $0x78] sm:$0xff] %v923_v23  ;;  %582 = vst [vmem:[#allocation2 + $0xf8] sm:$0xff] %v939_v24  ;;  %v475_v26 = vpop.f32.mrb[15].mxu0  ;;  %v539_v27 = vpop.f32.mrb[15].mxu1 }
 0x152   : > { %v686_v28 = vmax.f32 %v678_v15, 0.0  ;;  %v642_v30 = vld [vmem:[#allocation2 + $0xd1] ss:$2 sm:$0xff]  ;;  %v608_v31 = vld [vmem:[#allocation2 + $0xc0] ss:$2 sm:$0xff]  ;;  %564 = vst [vmem:[#allocation2 + $0x68] sm:$0xff] %v475_v26  ;;  %v651_v36 = vmax.f32 %v592_v22, %v624_v25 }
 0x153   : > { %v690_v29 = vmax.f32 %v682_v18, 0.0  ;;  %v640_v32 = vld [vmem:[#allocation2 + $0xc1] ss:$2 sm:$0xff]  ;;  %580 = vst [vmem:[#allocation2 + $0xe8] sm:$0xff] %v539_v27  ;;  %v660_v37 = vmax.f32 %v610_v21, %v642_v30 }
 0x154   : > { %v863_v33 = vpack.c.bf16 %v686_v28, %v685_v19  ;;  %v659_v38 = vmax.f32 %v608_v31, %v640_v32  ;;  %v665_v42 = vmax.f32 %v651_v36, %v652_v35 }
 0x155   : > { %v873_v34 = vpack.c.bf16 %v690_v29, %v689_v20 }
 0x156   : > { %864 = vst [vmem:[%s1388_s9] sm:$0xff] %v863_v33   ;;  %v669_v47 = vmax.f32 %v659_v38, %v660_v37  ;;  %v679_v54 = vadd.f32 %v1379_v56, %v665_v42 }
 0x157   : > { %881 = vst [vmem:[%s1388_s9 + $0x10] sm:$0xff] %v873_v34  }
 0x158   : > { %v598_v39 = vld [vmem:[#allocation2 + $0x70] ss:$2 sm:$0xff]  ;;  %v630_v40 = vld [vmem:[#allocation2 + $0x71] ss:$2 sm:$0xff]  ;;  %v683_v57 = vadd.f32 %v1379_v56, %v669_v47  ;;  %v687_v60 = vmax.f32 %v679_v54, 0.0 }
 0x159   : > { %v614_v41 = vld [vmem:[#allocation2 + $0xf0] ss:$2 sm:$0xff]  ;;  %v654_v43 = vmax.f32 %v598_v39, %v630_v40  ;;  %v646_v44 = vld [vmem:[#allocation2 + $0xf1] ss:$2 sm:$0xff]  ;;  %v596_v45 = vld [vmem:[#allocation2 + $0x60] ss:$2 sm:$0xff] }
 0x15a   : > { %v628_v46 = vld [vmem:[#allocation2 + $0x61] ss:$2 sm:$0xff]  ;;  %v662_v48 = vmax.f32 %v614_v41, %v646_v44  ;;  %v612_v50 = vld [vmem:[#allocation2 + $0xe0] ss:$2 sm:$0xff]  ;;  %v691_v62 = vmax.f32 %v683_v57, 0.0 }
 0x15b   : > { %v653_v49 = vmax.f32 %v596_v45, %v628_v46  ;;  %v644_v51 = vld [vmem:[#allocation2 + $0xe1] ss:$2 sm:$0xff] }
 0x15c   : > { %v661_v52 = vmax.f32 %v612_v50, %v644_v51 }
 0x15d   : > { %v666_v53 = vmax.f32 %v653_v49, %v654_v43 }
 0x15e   : > { %v670_v55 = vmax.f32 %v661_v52, %v662_v48 }
 0x15f   : > { %v680_v58 = vadd.f32 %v1379_v56, %v666_v53 }
 0x160   : > { %v684_v59 = vadd.f32 %v1379_v56, %v670_v55 }
 0x161   : > { %v688_v61 = vmax.f32 %v680_v58, 0.0 }
 0x162   : > { %v692_v63 = vmax.f32 %v684_v59, 0.0 }
 0x163   : > { %v868_v0 = vpack.c.bf16 %v688_v61, %v687_v60 }
 0x164   : > { %v878_v1 = vpack.c.bf16 %v692_v63, %v691_v62 }
 0x165   : > { %880 = vst [vmem:[%s1388_s9 + $0x8] sm:$0xff] %v868_v0  }
 0x166   : > { %882 = vst [vmem:[%s1388_s9 + $0x18] sm:$0xff] %v878_v1  }
 0x167   : > { %1099 = shalt.err (!%p1096_p7)
}
 0x168   : > { %s1100_s22 = scalar_lea.hbm %s1401_s27, 512  ;;  %s1104_s11 = scalar_lea.hbm %s1452_s3, 1024 }
 0x169   : > { %p1101_p9 = scmp.ne.s32.totalorder %s1401_s27, %s1100_s22  ;;  %p1105_p5 = scmp.lt.u32.totalorder %s1401_s27, %s1452_s3 }
 0x16a   : > { %p1106_p11 = scmp.lt.u32.totalorder %s1104_s11, %s1100_s22  ;;  %p1108_p4 = scmp.lt.u32.totalorder %s1100_s22, %s1401_s27 }
 0x16b   : > { %p1102_p1 = pnand %p1101_p9, %p1279_p12 }
 0x16c   : > { %p1107_p2 = por %p1106_p11, %p1105_p5 }
 0x16d   : > { %p1103_p0 = pneg %p1102_p1 }
 0x16e   : > { %p1109_p6 = por %p1108_p4, %p1107_p2 }
 0x170   : > { %p1110_p8 = pnand %p1109_p6, %p1103_p0 }
 0x172   : > { %1113 = shalt.err (!%p1110_p8)
}
 0x173   : > { %s1163_s8 = smov 64   ;;  %s1164_s9 = smov 4  }
 0x174   : > { %954 = dma.vmem_to_hbm [thread:$0]  (%p1279_p12), %s1403_s25, 512, %s1401_s27, %s710_s16, %s1163_s8, %s1163_s8, %s1164_s9  }
 0x175 PF: > { %s738_s4 = sand.u32 1, %s1144_s12   ;;  %p1467_p10 = scmp.ne.s32.totalorder %s1457_s19, 0 }
 0x176   : > { %p1468_p13 = scmp.ge.s32.totalorder %s1156_s15, 2  ;;  %s739_s26 = scalar_lea.sflag [#allocation5], %s738_s4 }
 0x178   : > { %p965_p3 = pnand %p1468_p13, %p1467_p10 }
 0x17a   : > { %1139 = dma.done.wait (!%p965_p3), %s739_s26, 512  }
 0x17b   : > { %1141 = vsyncadd (!%p965_p3), %s739_s26, 4294966784  ;;  %p17_p7 = scmp.ge.s32.totalorder %s1241_s24, 4   ;;  %s1469_s12 = smov %s1148_s13 }
 0x17c   : > { %s1470_s13 = smov %s1152_s14  ;;  %s1471_s14 = smov %s1275_s17 }
 0x17d   : > { %s1472_s15 = smov %s1241_s24  ;;  %19 = sbr.rel (!%p17_p7) target bundleno = 6 (0x6), region = 112 }
 0x184   :  { %744 = vsyncpa [#allocation4], 1 }
 0x185   :  { %746 = vsyncpa [#allocation4 + $0x1], 1 }
 0x186   :  { %747 = vsyncpa [#allocation7], 1 }
 0x187   :  { %748 = vsyncpa [#allocation5], 1 }
 0x188   :  { %750 = vsyncpa [#allocation5 + $0x1], 1 }

</bundles_post_ra>
